<compile_context>
chip_gen: v7x
topology: tpu7x:2x2x1
jax: 0.10.0
libtpu: 0.0.40
codegen_flags: <defaults>
</compile_context>

<pallas_src>
import jax
import jax.numpy as jnp
from jax import lax
from jax.experimental import pallas as pl
from jax.experimental.pallas import tpu as pltpu

REPEAT = 416          # output == gelu^6(x1) tiled 416x along the last axis
_N_GELU = 6
_INV_SQRT2 = 0.7071067811865476


def _gelu_exact(x):
    # Matches torch.nn.functional.gelu default (erf-based, not tanh approx).
    return 0.5 * x * (1.0 + lax.erf(x * _INV_SQRT2))


def _kernel(x_ref, o_ref, tiled_ref):
    # grid = (row_tiles, repeat_chunks); repeat axis is innermost ("arbitrary").
    j = pl.program_id(1)
    chunk = o_ref.shape[-1] // x_ref.shape[-1]

    @pl.when(j == 0)
    def _():
        # Compute gelu^6 once per row tile (in f32 for accuracy), cast to the
        # output dtype, tile across the chunk width, and park it in VMEM
        # scratch so every repeat chunk is just a copy (one vst stream).
        g = x_ref[...].astype(jnp.float32)
        for _ in range(_N_GELU):
            g = _gelu_exact(g)
        tiled_ref[...] = jnp.tile(g.astype(tiled_ref.dtype), (1, 1, chunk))

    o_ref[...] = tiled_ref[...]


def _auto_tiles(B, R, D, itemsize, out_block_budget_bytes):
    # Row tile: second-to-last block dim must be a multiple of the sublane
    # granularity (8 for 32-bit, 16 for 16-bit) or equal to the full extent.
    sub = 8 if itemsize >= 4 else 16
    if R % sub == 0:
        row_tile = sub
        while row_tile * 2 <= min(R, 256) and R % (row_tile * 2) == 0:
            row_tile *= 2
    else:
        row_tile = R

    # Repeat chunk: must divide 416 and give a lane-dense (multiple-of-128)
    # output block width, unless it is the full 416 (block == full last dim).
    divisors = sorted((c for c in range(1, REPEAT + 1) if REPEAT % c == 0),
                      reverse=True)
    lane_ok = [c for c in divisors if c == REPEAT or (c * D) % 128 == 0]
    repeat_chunk = None
    for c in lane_ok:
        if B * row_tile * c * D * itemsize <= out_block_budget_bytes:
            repeat_chunk = c
            break
    if repeat_chunk is None:      # nothing fits the budget: smallest valid chunk
        repeat_chunk = lane_ok[-1]
    return row_tile, repeat_chunk


def model_forward(x, *, row_tile=None, repeat_chunk=None,
                  out_block_budget_bytes=6 * 1024 * 1024):
    """Pallas TPU forward of `Model`: out = gelu^6(x) tiled 416x on last dim."""
    B, R, D = x.shape
    itemsize = jnp.dtype(x.dtype).itemsize
    auto_rt, auto_rc = _auto_tiles(B, R, D, itemsize, out_block_budget_bytes)
    if row_tile is None:
        row_tile = auto_rt
    if repeat_chunk is None:
        repeat_chunk = auto_rc
    assert R % row_tile == 0, (R, row_tile)
    assert REPEAT % repeat_chunk == 0, (REPEAT, repeat_chunk)

    n_row_tiles = R // row_tile
    n_chunks = REPEAT // repeat_chunk
    out_w = repeat_chunk * D

    grid_spec = pltpu.PrefetchScalarGridSpec(
        num_scalar_prefetch=0,
        grid=(n_row_tiles, n_chunks),                       # repeat axis innermost
        in_specs=[pl.BlockSpec((B, row_tile, D), lambda i, j: (0, i, 0))],
        out_specs=pl.BlockSpec((B, row_tile, out_w), lambda i, j: (0, i, j)),
        scratch_shapes=[pltpu.VMEM((B, row_tile, out_w), x.dtype)],
    )
    cost = pl.CostEstimate(
        flops=30 * _N_GELU * B * R * D,
        transcendentals=_N_GELU * B * R * D,
        bytes_accessed=B * R * D * itemsize * (1 + REPEAT),
    )
    return pl.pallas_call(
        _kernel,
        out_shape=jax.ShapeDtypeStruct((B, R, REPEAT * D), x.dtype),
        grid_spec=grid_spec,
        compiler_params=pltpu.CompilerParams(
            dimension_semantics=("parallel", "arbitrary"),
            vmem_limit_bytes=32 * 1024 * 1024,
        ),
        cost_estimate=cost,
    )(x)


def model_ref(x1):
    """Literal pure-JAX transcription of the PyTorch forward, for checking."""
    G = lambda a: jax.nn.gelu(a, approximate=False)
    cat = lambda *xs: jnp.concatenate(xs, axis=-1)
    x2 = cat(G(x1), G(x1))
    x3 = cat(G(x2), G(x2))
    x4 = cat(G(x3), G(x3))
    x5 = cat(G(x4), G(x4))
    x6 = cat(G(x5), G(x5))
    x7 = cat(x6, G(x5))
    x8 = cat(x7, G(x5))
    x9 = cat(x8, G(x5))
    x10 = cat(x9, G(x5))
    x11 = cat(x10, G(x5))
    x12 = cat(x11, G(x5))
    x13 = cat(x12, G(x5))
    x14 = cat(x13, G(x5))
    x15 = cat(x14, G(x5))
    x16 = cat(x15, G(x5))
    x17 = cat(x16, G(x5))
    x18 = cat(G(x17), G(x17))
    return x18


if __name__ == "__main__":
    key = jax.random.PRNGKey(0)
    k1, k2 = jax.random.split(key)

    # Test 1: the module's example shape (1, 2, 2) -> (1, 2, 832).
    x1 = jax.random.normal(k1, (1, 2, 2), dtype=jnp.float32)
    out1 = jax.block_until_ready(model_forward(x1))
    ref1 = model_ref(x1)
    assert out1.shape == ref1.shape == (1, 2, 2 * REPEAT), (out1.shape, ref1.shape)
    assert jnp.allclose(out1, ref1, atol=1e-5, rtol=1e-5), "mismatch (toy shape)"

    # Test 2: a modest shape that actually exercises the (row-tile, repeat-chunk)
    # grid, compute-once scratch, and lane-dense chunked output writeback.
    x2 = jax.random.normal(k2, (1, 32, 256), dtype=jnp.float32)
    out2 = jax.block_until_ready(model_forward(x2, row_tile=8, repeat_chunk=104))
    ref2 = model_ref(x2)
    assert out2.shape == ref2.shape == (1, 32, REPEAT * 256), (out2.shape, ref2.shape)
    assert jnp.allclose(out2, ref2, atol=1e-5, rtol=1e-5), "mismatch (tiled shape)"

    print("KERNEL_OK")
</pallas_src>

<mosaic_0001>
module attributes {stable_mosaic.version = 11 : i64} {
  func.func @_kernel(%arg0: i32, %arg1: i32, %arg2: memref<1x2x2xf32, #tpu.memory_space<vmem>>, %arg3: memref<1x2x832xf32, #tpu.memory_space<vmem>>, %arg4: memref<1x2x832xf32, #tpu.memory_space<vmem>>) attributes {dimension_semantics = [#tpu.dimension_semantics<parallel>, #tpu.dimension_semantics<arbitrary>], iteration_bounds = array<i64: 1, 1>, scalar_prefetch = 0 : i64, scratch_operands = 1 : i64, tpu.core_type = #tpu.core_type<tc>, window_params = [{transform_indices = @transform_0, window_bounds = array<i64: 1, 2, 2>}, {transform_indices = @transform_1, window_bounds = array<i64: 1, 2, 832>}]} {
    %c0_i32 = arith.constant 0 : i32
    %0 = arith.cmpi eq, %arg1, %c0_i32 : i32
    %1 = arith.extui %0 : i1 to i32
    %c0_i32_0 = arith.constant 0 : i32
    %2 = arith.cmpi ne, %1, %c0_i32_0 : i32
    scf.if %2 {
      %c0_6 = arith.constant 0 : index
      %c0_7 = arith.constant 0 : index
      %c0_8 = arith.constant 0 : index
      %5 = vector.load %arg2[%c0_6, %c0_7, %c0_8] : memref<1x2x2xf32, #tpu.memory_space<vmem>>, vector<1x2x2xf32>
      %cst = arith.constant 5.000000e-01 : f32
      %6 = vector.broadcast %cst : f32 to vector<1x2x2xf32>
      %7 = arith.mulf %6, %5 : vector<1x2x2xf32>
      %cst_9 = arith.constant 0.707106769 : f32
      %8 = vector.broadcast %cst_9 : f32 to vector<1x2x2xf32>
      %9 = arith.mulf %5, %8 : vector<1x2x2xf32>
      %10 = math.erf %9 : vector<1x2x2xf32>
      %cst_10 = arith.constant 1.000000e+00 : f32
      %11 = vector.broadcast %cst_10 : f32 to vector<1x2x2xf32>
      %12 = arith.addf %11, %10 : vector<1x2x2xf32>
      %13 = arith.mulf %7, %12 : vector<1x2x2xf32>
      %cst_11 = arith.constant 5.000000e-01 : f32
      %14 = vector.broadcast %cst_11 : f32 to vector<1x2x2xf32>
      %15 = arith.mulf %14, %13 : vector<1x2x2xf32>
      %cst_12 = arith.constant 0.707106769 : f32
      %16 = vector.broadcast %cst_12 : f32 to vector<1x2x2xf32>
      %17 = arith.mulf %13, %16 : vector<1x2x2xf32>
      %18 = math.erf %17 : vector<1x2x2xf32>
      %cst_13 = arith.constant 1.000000e+00 : f32
      %19 = vector.broadcast %cst_13 : f32 to vector<1x2x2xf32>
      %20 = arith.addf %19, %18 : vector<1x2x2xf32>
      %21 = arith.mulf %15, %20 : vector<1x2x2xf32>
      %cst_14 = arith.constant 5.000000e-01 : f32
      %22 = vector.broadcast %cst_14 : f32 to vector<1x2x2xf32>
      %23 = arith.mulf %22, %21 : vector<1x2x2xf32>
      %cst_15 = arith.constant 0.707106769 : f32
      %24 = vector.broadcast %cst_15 : f32 to vector<1x2x2xf32>
      %25 = arith.mulf %21, %24 : vector<1x2x2xf32>
      %26 = math.erf %25 : vector<1x2x2xf32>
      %cst_16 = arith.constant 1.000000e+00 : f32
      %27 = vector.broadcast %cst_16 : f32 to vector<1x2x2xf32>
      %28 = arith.addf %27, %26 : vector<1x2x2xf32>
      %29 = arith.mulf %23, %28 : vector<1x2x2xf32>
      %cst_17 = arith.constant 5.000000e-01 : f32
      %30 = vector.broadcast %cst_17 : f32 to vector<1x2x2xf32>
      %31 = arith.mulf %30, %29 : vector<1x2x2xf32>
      %cst_18 = arith.constant 0.707106769 : f32
      %32 = vector.broadcast %cst_18 : f32 to vector<1x2x2xf32>
      %33 = arith.mulf %29, %32 : vector<1x2x2xf32>
      %34 = math.erf %33 : vector<1x2x2xf32>
      %cst_19 = arith.constant 1.000000e+00 : f32
      %35 = vector.broadcast %cst_19 : f32 to vector<1x2x2xf32>
      %36 = arith.addf %35, %34 : vector<1x2x2xf32>
      %37 = arith.mulf %31, %36 : vector<1x2x2xf32>
      %cst_20 = arith.constant 5.000000e-01 : f32
      %38 = vector.broadcast %cst_20 : f32 to vector<1x2x2xf32>
      %39 = arith.mulf %38, %37 : vector<1x2x2xf32>
      %cst_21 = arith.constant 0.707106769 : f32
      %40 = vector.broadcast %cst_21 : f32 to vector<1x2x2xf32>
      %41 = arith.mulf %37, %40 : vector<1x2x2xf32>
      %42 = math.erf %41 : vector<1x2x2xf32>
      %cst_22 = arith.constant 1.000000e+00 : f32
      %43 = vector.broadcast %cst_22 : f32 to vector<1x2x2xf32>
      %44 = arith.addf %43, %42 : vector<1x2x2xf32>
      %45 = arith.mulf %39, %44 : vector<1x2x2xf32>
      %cst_23 = arith.constant 5.000000e-01 : f32
      %46 = vector.broadcast %cst_23 : f32 to vector<1x2x2xf32>
      %47 = arith.mulf %46, %45 : vector<1x2x2xf32>
      %cst_24 = arith.constant 0.707106769 : f32
      %48 = vector.broadcast %cst_24 : f32 to vector<1x2x2xf32>
      %49 = arith.mulf %45, %48 : vector<1x2x2xf32>
      %50 = math.erf %49 : vector<1x2x2xf32>
      %cst_25 = arith.constant 1.000000e+00 : f32
      %51 = vector.broadcast %cst_25 : f32 to vector<1x2x2xf32>
      %52 = arith.addf %51, %50 : vector<1x2x2xf32>
      %53 = arith.mulf %47, %52 : vector<1x2x2xf32>
      %54 = tpu.concatenate %53, %53, %53, %53, %53, %53, %53, %53, %53, %53, %53, %53, %53, %53, %53, %53, %53, %53, %53, %53, %53, %53, %53, %53, %53, %53, %53, %53, %53, %53, %53, %53, %53, %53, %53, %53, %53, %53, %53, %53, %53, %53, %53, %53, %53, %53, %53, %53, %53, %53, %53, %53, %53, %53, %53, %53, %53, %53, %53, %53, %53, %53, %53, %53, %53, %53, %53, %53, %53, %53, %53, %53, %53, %53, %53, %53, %53, %53, %53, %53, %53, %53, %53, %53, %53, %53, %53, %53, %53, %53, %53, %53, %53, %53, %53, %53, %53, %53, %53, %53, %53, %53, %53, %53, %53, %53, %53, %53, %53, %53, %53, %53, %53, %53, %53, %53, %53, %53, %53, %53, %53, %53, %53, %53, %53, %53, %53, %53, %53, %53, %53, %53, %53, %53, %53, %53, %53, %53, %53, %53, %53, %53, %53, %53, %53, %53, %53, %53, %53, %53, %53, %53, %53, %53, %53, %53, %53, %53, %53, %53, %53, %53, %53, %53, %53, %53, %53, %53, %53, %53, %53, %53, %53, %53, %53, %53, %53, %53, %53, %53, %53, %53, %53, %53, %53, %53, %53, %53, %53, %53, %53, %53, %53, %53, %53, %53, %53, %53, %53, %53, %53, %53, %53, %53, %53, %53, %53, %53, %53, %53, %53, %53, %53, %53, %53, %53, %53, %53, %53, %53, %53, %53, %53, %53, %53, %53, %53, %53, %53, %53, %53, %53, %53, %53, %53, %53, %53, %53, %53, %53, %53, %53, %53, %53, %53, %53, %53, %53, %53, %53, %53, %53, %53, %53, %53, %53, %53, %53, %53, %53, %53, %53, %53, %53, %53, %53, %53, %53, %53, %53, %53, %53, %53, %53, %53, %53, %53, %53, %53, %53, %53, %53, %53, %53, %53, %53, %53, %53, %53, %53, %53, %53, %53, %53, %53, %53, %53, %53, %53, %53, %53, %53, %53, %53, %53, %53, %53, %53, %53, %53, %53, %53, %53, %53, %53, %53, %53, %53, %53, %53, %53, %53, %53, %53, %53, %53, %53, %53, %53, %53, %53, %53, %53, %53, %53, %53, %53, %53, %53, %53, %53, %53, %53, %53, %53, %53, %53, %53, %53, %53, %53, %53, %53, %53, %53, %53, %53, %53, %53, %53, %53, %53, %53, %53, %53, %53, %53, %53, %53, %53, %53, %53, %53, %53, %53, %53, %53, %53, %53, %53, %53, %53, %53, %53, %53, %53, %53, %53, %53, %53, %53, %53, %53, %53, %53, %53, %53, %53, %53, %53, %53, %53, %53, %53, %53, %53, %53, %53, %53, %53, %53, %53, %53, %53, %53, %53 in 2 : vector<1x2x2xf32>, vector<1x2x2xf32>, vector<1x2x2xf32>, vector<1x2x2xf32>, vector<1x2x2xf32>, vector<1x2x2xf32>, vector<1x2x2xf32>, vector<1x2x2xf32>, vector<1x2x2xf32>, vector<1x2x2xf32>, vector<1x2x2xf32>, vector<1x2x2xf32>, vector<1x2x2xf32>, vector<1x2x2xf32>, vector<1x2x2xf32>, vector<1x2x2xf32>, vector<1x2x2xf32>, vector<1x2x2xf32>, vector<1x2x2xf32>, vector<1x2x2xf32>, vector<1x2x2xf32>, vector<1x2x2xf32>, vector<1x2x2xf32>, vector<1x2x2xf32>, vector<1x2x2xf32>, vector<1x2x2xf32>, vector<1x2x2xf32>, vector<1x2x2xf32>, vector<1x2x2xf32>, vector<1x2x2xf32>, vector<1x2x2xf32>, vector<1x2x2xf32>, vector<1x2x2xf32>, vector<1x2x2xf32>, vector<1x2x2xf32>, vector<1x2x2xf32>, vector<1x2x2xf32>, vector<1x2x2xf32>, vector<1x2x2xf32>, vector<1x2x2xf32>, vector<1x2x2xf32>, vector<1x2x2xf32>, vector<1x2x2xf32>, vector<1x2x2xf32>, vector<1x2x2xf32>, vector<1x2x2xf32>, vector<1x2x2xf32>, vector<1x2x2xf32>, vector<1x2x2xf32>, vector<1x2x2xf32>, vector<1x2x2xf32>, vector<1x2x2xf32>, vector<1x2x2xf32>, vector<1x2x2xf32>, vector<1x2x2xf32>, vector<1x2x2xf32>, vector<1x2x2xf32>, vector<1x2x2xf32>, vector<1x2x2xf32>, vector<1x2x2xf32>, vector<1x2x2xf32>, vector<1x2x2xf32>, vector<1x2x2xf32>, vector<1x2x2xf32>, vector<1x2x2xf32>, vector<1x2x2xf32>, vector<1x2x2xf32>, vector<1x2x2xf32>, vector<1x2x2xf32>, vector<1x2x2xf32>, vector<1x2x2xf32>, vector<1x2x2xf32>, vector<1x2x2xf32>, vector<1x2x2xf32>, vector<1x2x2xf32>, vector<1x2x2xf32>, vector<1x2x2xf32>, vector<1x2x2xf32>, vector<1x2x2xf32>, vector<1x2x2xf32>, vector<1x2x2xf32>, vector<1x2x2xf32>, vector<1x2x2xf32>, vector<1x2x2xf32>, vector<1x2x2xf32>, vector<1x2x2xf32>, vector<1x2x2xf32>, vector<1x2x2xf32>, vector<1x2x2xf32>, vector<1x2x2xf32>, vector<1x2x2xf32>, vector<1x2x2xf32>, vector<1x2x2xf32>, vector<1x2x2xf32>, vector<1x2x2xf32>, vector<1x2x2xf32>, vector<1x2x2xf32>, vector<1x2x2xf32>, vector<1x2x2xf32>, vector<1x2x2xf32>, vector<1x2x2xf32>, vector<1x2x2xf32>, vector<1x2x2xf32>, vector<1x2x2xf32>, vector<1x2x2xf32>, vector<1x2x2xf32>, vector<1x2x2xf32>, vector<1x2x2xf32>, vector<1x2x2xf32>, vector<1x2x2xf32>, vector<1x2x2xf32>, vector<1x2x2xf32>, vector<1x2x2xf32>, vector<1x2x2xf32>, vector<1x2x2xf32>, vector<1x2x2xf32>, vector<1x2x2xf32>, vector<1x2x2xf32>, vector<1x2x2xf32>, vector<1x2x2xf32>, vector<1x2x2xf32>, vector<1x2x2xf32>, vector<1x2x2xf32>, vector<1x2x2xf32>, vector<1x2x2xf32>, vector<1x2x2xf32>, vector<1x2x2xf32>, vector<1x2x2xf32>, vector<1x2x2xf32>, vector<1x2x2xf32>, vector<1x2x2xf32>, vector<1x2x2xf32>, vector<1x2x2xf32>, vector<1x2x2xf32>, vector<1x2x2xf32>, vector<1x2x2xf32>, vector<1x2x2xf32>, vector<1x2x2xf32>, vector<1x2x2xf32>, vector<1x2x2xf32>, vector<1x2x2xf32>, vector<1x2x2xf32>, vector<1x2x2xf32>, vector<1x2x2xf32>, vector<1x2x2xf32>, vector<1x2x2xf32>, vector<1x2x2xf32>, vector<1x2x2xf32>, vector<1x2x2xf32>, vector<1x2x2xf32>, vector<1x2x2xf32>, vector<1x2x2xf32>, vector<1x2x2xf32>, vector<1x2x2xf32>, vector<1x2x2xf32>, vector<1x2x2xf32>, vector<1x2x2xf32>, vector<1x2x2xf32>, vector<1x2x2xf32>, vector<1x2x2xf32>, vector<1x2x2xf32>, vector<1x2x2xf32>, vector<1x2x2xf32>, vector<1x2x2xf32>, vector<1x2x2xf32>, vector<1x2x2xf32>, vector<1x2x2xf32>, vector<1x2x2xf32>, vector<1x2x2xf32>, vector<1x2x2xf32>, vector<1x2x2xf32>, vector<1x2x2xf32>, vector<1x2x2xf32>, vector<1x2x2xf32>, vector<1x2x2xf32>, vector<1x2x2xf32>, vector<1x2x2xf32>, vector<1x2x2xf32>, vector<1x2x2xf32>, vector<1x2x2xf32>, vector<1x2x2xf32>, vector<1x2x2xf32>, vector<1x2x2xf32>, vector<1x2x2xf32>, vector<1x2x2xf32>, vector<1x2x2xf32>, vector<1x2x2xf32>, vector<1x2x2xf32>, vector<1x2x2xf32>, vector<1x2x2xf32>, vector<1x2x2xf32>, vector<1x2x2xf32>, vector<1x2x2xf32>, vector<1x2x2xf32>, vector<1x2x2xf32>, vector<1x2x2xf32>, vector<1x2x2xf32>, vector<1x2x2xf32>, vector<1x2x2xf32>, vector<1x2x2xf32>, vector<1x2x2xf32>, vector<1x2x2xf32>, vector<1x2x2xf32>, vector<1x2x2xf32>, vector<1x2x2xf32>, vector<1x2x2xf32>, vector<1x2x2xf32>, vector<1x2x2xf32>, vector<1x2x2xf32>, vector<1x2x2xf32>, vector<1x2x2xf32>, vector<1x2x2xf32>, vector<1x2x2xf32>, vector<1x2x2xf32>, vector<1x2x2xf32>, vector<1x2x2xf32>, vector<1x2x2xf32>, vector<1x2x2xf32>, vector<1x2x2xf32>, vector<1x2x2xf32>, vector<1x2x2xf32>, vector<1x2x2xf32>, vector<1x2x2xf32>, vector<1x2x2xf32>, vector<1x2x2xf32>, vector<1x2x2xf32>, vector<1x2x2xf32>, vector<1x2x2xf32>, vector<1x2x2xf32>, vector<1x2x2xf32>, vector<1x2x2xf32>, vector<1x2x2xf32>, vector<1x2x2xf32>, vector<1x2x2xf32>, vector<1x2x2xf32>, vector<1x2x2xf32>, vector<1x2x2xf32>, vector<1x2x2xf32>, vector<1x2x2xf32>, vector<1x2x2xf32>, vector<1x2x2xf32>, vector<1x2x2xf32>, vector<1x2x2xf32>, vector<1x2x2xf32>, vector<1x2x2xf32>, vector<1x2x2xf32>, vector<1x2x2xf32>, vector<1x2x2xf32>, vector<1x2x2xf32>, vector<1x2x2xf32>, vector<1x2x2xf32>, vector<1x2x2xf32>, vector<1x2x2xf32>, vector<1x2x2xf32>, vector<1x2x2xf32>, vector<1x2x2xf32>, vector<1x2x2xf32>, vector<1x2x2xf32>, vector<1x2x2xf32>, vector<1x2x2xf32>, vector<1x2x2xf32>, vector<1x2x2xf32>, vector<1x2x2xf32>, vector<1x2x2xf32>, vector<1x2x2xf32>, vector<1x2x2xf32>, vector<1x2x2xf32>, vector<1x2x2xf32>, vector<1x2x2xf32>, vector<1x2x2xf32>, vector<1x2x2xf32>, vector<1x2x2xf32>, vector<1x2x2xf32>, vector<1x2x2xf32>, vector<1x2x2xf32>, vector<1x2x2xf32>, vector<1x2x2xf32>, vector<1x2x2xf32>, vector<1x2x2xf32>, vector<1x2x2xf32>, vector<1x2x2xf32>, vector<1x2x2xf32>, vector<1x2x2xf32>, vector<1x2x2xf32>, vector<1x2x2xf32>, vector<1x2x2xf32>, vector<1x2x2xf32>, vector<1x2x2xf32>, vector<1x2x2xf32>, vector<1x2x2xf32>, vector<1x2x2xf32>, vector<1x2x2xf32>, vector<1x2x2xf32>, vector<1x2x2xf32>, vector<1x2x2xf32>, vector<1x2x2xf32>, vector<1x2x2xf32>, vector<1x2x2xf32>, vector<1x2x2xf32>, vector<1x2x2xf32>, vector<1x2x2xf32>, vector<1x2x2xf32>, vector<1x2x2xf32>, vector<1x2x2xf32>, vector<1x2x2xf32>, vector<1x2x2xf32>, vector<1x2x2xf32>, vector<1x2x2xf32>, vector<1x2x2xf32>, vector<1x2x2xf32>, vector<1x2x2xf32>, vector<1x2x2xf32>, vector<1x2x2xf32>, vector<1x2x2xf32>, vector<1x2x2xf32>, vector<1x2x2xf32>, vector<1x2x2xf32>, vector<1x2x2xf32>, vector<1x2x2xf32>, vector<1x2x2xf32>, vector<1x2x2xf32>, vector<1x2x2xf32>, vector<1x2x2xf32>, vector<1x2x2xf32>, vector<1x2x2xf32>, vector<1x2x2xf32>, vector<1x2x2xf32>, vector<1x2x2xf32>, vector<1x2x2xf32>, vector<1x2x2xf32>, vector<1x2x2xf32>, vector<1x2x2xf32>, vector<1x2x2xf32>, vector<1x2x2xf32>, vector<1x2x2xf32>, vector<1x2x2xf32>, vector<1x2x2xf32>, vector<1x2x2xf32>, vector<1x2x2xf32>, vector<1x2x2xf32>, vector<1x2x2xf32>, vector<1x2x2xf32>, vector<1x2x2xf32>, vector<1x2x2xf32>, vector<1x2x2xf32>, vector<1x2x2xf32>, vector<1x2x2xf32>, vector<1x2x2xf32>, vector<1x2x2xf32>, vector<1x2x2xf32>, vector<1x2x2xf32>, vector<1x2x2xf32>, vector<1x2x2xf32>, vector<1x2x2xf32>, vector<1x2x2xf32>, vector<1x2x2xf32>, vector<1x2x2xf32>, vector<1x2x2xf32>, vector<1x2x2xf32>, vector<1x2x2xf32>, vector<1x2x2xf32>, vector<1x2x2xf32>, vector<1x2x2xf32>, vector<1x2x2xf32>, vector<1x2x2xf32>, vector<1x2x2xf32>, vector<1x2x2xf32>, vector<1x2x2xf32>, vector<1x2x2xf32>, vector<1x2x2xf32>, vector<1x2x2xf32>, vector<1x2x2xf32>, vector<1x2x2xf32>, vector<1x2x2xf32>, vector<1x2x2xf32>, vector<1x2x2xf32>, vector<1x2x2xf32>, vector<1x2x2xf32>, vector<1x2x2xf32>, vector<1x2x2xf32>, vector<1x2x2xf32>, vector<1x2x2xf32>, vector<1x2x2xf32>, vector<1x2x2xf32>, vector<1x2x2xf32>, vector<1x2x2xf32>, vector<1x2x2xf32>, vector<1x2x2xf32>, vector<1x2x2xf32>, vector<1x2x2xf32>, vector<1x2x2xf32>, vector<1x2x2xf32>, vector<1x2x2xf32>, vector<1x2x2xf32>, vector<1x2x2xf32>, vector<1x2x2xf32>, vector<1x2x2xf32>, vector<1x2x2xf32>, vector<1x2x2xf32>, vector<1x2x2xf32>, vector<1x2x2xf32>, vector<1x2x2xf32>, vector<1x2x2xf32>, vector<1x2x2xf32>, vector<1x2x2xf32>, vector<1x2x2xf32>, vector<1x2x2xf32>, vector<1x2x2xf32>, vector<1x2x2xf32>, vector<1x2x2xf32>, vector<1x2x2xf32>, vector<1x2x2xf32>, vector<1x2x2xf32>, vector<1x2x2xf32>, vector<1x2x2xf32>, vector<1x2x2xf32> -> vector<1x2x832xf32>
      %c0_26 = arith.constant 0 : index
      %c0_27 = arith.constant 0 : index
      %c0_28 = arith.constant 0 : index
      %55 = vector.load %arg4[%c0_26, %c0_27, %c0_28] : memref<1x2x832xf32, #tpu.memory_space<vmem>>, vector<1x2x832xf32>
      tpu.vector_store %arg4[%c0_26, %c0_27, %c0_28], %54 {strides = array<i32>} : memref<1x2x832xf32, #tpu.memory_space<vmem>>, vector<1x2x832xf32>,
    } else {
    }
    %c0 = arith.constant 0 : index
    %c0_1 = arith.constant 0 : index
    %c0_2 = arith.constant 0 : index
    %3 = vector.load %arg4[%c0, %c0_1, %c0_2] : memref<1x2x832xf32, #tpu.memory_space<vmem>>, vector<1x2x832xf32>
    %c0_3 = arith.constant 0 : index
    %c0_4 = arith.constant 0 : index
    %c0_5 = arith.constant 0 : index
    %4 = vector.load %arg3[%c0_3, %c0_4, %c0_5] : memref<1x2x832xf32, #tpu.memory_space<vmem>>, vector<1x2x832xf32>
    tpu.vector_store %arg3[%c0_3, %c0_4, %c0_5], %3 {strides = array<i32>} : memref<1x2x832xf32, #tpu.memory_space<vmem>>, vector<1x2x832xf32>,
    return
  }
  func.func @transform_0(%arg0: i32, %arg1: i32) -> (i32, i32, i32) {
    %c0_i32 = arith.constant 0 : i32
    %c0_i32_0 = arith.constant 0 : i32
    %c0_i32_1 = arith.constant 0 : i32
    return %c0_i32, %arg0, %c0_i32_0 : i32, i32, i32
  }
  func.func @transform_1(%arg0: i32, %arg1: i32) -> (i32, i32, i32) {
    %c0_i32 = arith.constant 0 : i32
    %c0_i32_0 = arith.constant 0 : i32
    return %c0_i32, %arg0, %arg1 : i32, i32, i32
  }
}

</mosaic_0001>

<bundles_post_ra>
// kernel: tpu_custom_call.1
= control target key start
LH: loop header
LB: loop body
LE: loop exit
PB: predicated region body
PF: predicated region fallthrough
CT: control target
= control target key end

     0   :  { %6 = vsyncpa [#allocation4], 0  ;;  %s720_s0 = inlined_call_operand.hbm [shape: f32[1,2,2], index: 0, kind: input, shape index: {}]   ;;  %s721_s1 = inlined_call_operand.hbm [shape: f32[1,2,832], index: 1, kind: output, shape index: {}]  }
   0x1   :  { %7 = vsyncpa [#allocation5], 0  ;;  %s550_s6 = smov [#allocation3]   ;;  %s502_s10 = scalar_lea.hbm %s720_s0, 32 }
   0x2   :  { %s14_s7 = sshll.u32 %s550_s6, 4  ;;  %p503_p0 = scmp.ne.s32.totalorder %s720_s0, %s502_s10  ;;  %s15_s7 = int_to_ptr.vmem [resolvable:$true] %s14_s7 }
   0x3   :  { %p506_p1 = scmp.lt.u32.totalorder %s502_s10, %s720_s0 }
   0x5   :  { %p508_p2 = pnand %p506_p1, %p503_p0 }
   0x7   :  { %511 = shalt.err (!%p508_p2)
}
   0x8   :  { %s512_s15 = scalar_lea.vmem %s15_s7, 32  ;;  %p517_p4 = scmp.lt.s32.totalorder %s15_s7, %s15_s7 }
   0x9   :  { %p513_p3 = scmp.ne.s32.totalorder %s15_s7, %s512_s15  ;;  %p518_p5 = scmp.lt.s32.totalorder %s512_s15, %s512_s15 }
   0xb   :  { %p519_p6 = por %p518_p5, %p517_p4 }
   0xd   :  { %p520_p7 = pnand %p519_p6, %p513_p3 }
   0xf   :  { %523 = shalt.err (!%p520_p7)
}
  0x10   :  { %17 = dma.hbm_to_vmem [thread:$0]  %s720_s0, 32, %s15_s7, [#allocation4]  }
  0x11   :  { %546 = dma.done.wait [#allocation4], 32  }
  0x12   :  { %547 = vsyncadd [#allocation4], 4294967264  ;;  %v25_v0 = vld [vmem:[#allocation3] sm:$0x3]  ;;  %s551_s0 = smov 2   ;;  %s552_s18 = smov 6  }
  0x13   :  { %v27_v1 = vmul.f32 0.70710677, %v25_v0  ;;  %v26_v2 = vmul.f32 0.5, %v25_v0  ;;  %s553_s19 = smov 4   ;;  %s554_s20 = smov 8   ;;  %vm246_vm0 = vcmask 15360  }
  0x14   :  { %s555_s21 = smov 10   ;;  %s556_s22 = smov 12   ;;  %vm248_vm1 = vcmask 31744   ;;  %vm250_vm2 = vcmask 48128   ;;  %vm252_vm3 = vcmask 64512   ;;  %vm254_vm4 = vcmask 80896  }
  0x15   :  { %490 = verf.f32 %v27_v1  ;;  %s557_s23 = smov 14   ;;  %s558_s24 = smov 16   ;;  %vm256_vm5 = vcmask 97280   ;;  %vm258_vm6 = vcmask 113664   ;;  %vm260_vm7 = vcmask 130048  }
  0x16   :  { %s559_s25 = smov 18   ;;  %s560_s26 = smov 20   ;;  %vm262_vm8 = vcmask 146432   ;;  %vm264_vm9 = vcmask 162816   ;;  %vm266_vm10 = vcmask 179200   ;;  %vm268_vm11 = vcmask 195584  }
  0x17   :  { %s561_s27 = smov 22   ;;  %s562_s28 = smov 24   ;;  %vm270_vm12 = vcmask 211968   ;;  %vm272_vm13 = vcmask 228352   ;;  %vm274_vm14 = vcmask 244736   ;;  %vm276_vm15 = vcmask 261120  }
  0x18   :  { %s563_s29 = smov 26   ;;  %s564_s30 = smov 28  }
  0x19   :  { %s565_s2 = smov 30   ;;  %s566_s3 = smov 32  }
  0x1a   :  { %s567_s4 = smov 34   ;;  %s568_s5 = smov 36  }
  0x1b   :  { %s569_s6 = smov 38   ;;  %s570_s7 = smov 40  }
  0x1c   :  { %s571_s8 = smov 42   ;;  %s572_s9 = smov 44  }
  0x1d   :  { %s573_s10 = smov 46   ;;  %s574_s11 = smov 48  }
  0x1e   :  { %s575_s12 = smov 50   ;;  %s576_s13 = smov 52  }
  0x1f   :  { %v491_v3 = vpop.eup %490  ;;  %s577_s14 = smov 54   ;;  %s578_s15 = smov 56  }
  0x20   :  { %v29_v4 = vadd.f32 1.0, %v491_v3  ;;  %s579_s16 = smov 58   ;;  %s580_s17 = smov 60  }
  0x22   :  { %v30_v5 = vmul.f32 %v29_v4, %v26_v2 }
  0x24   :  { %v32_v6 = vmul.f32 0.70710677, %v30_v5  ;;  %v31_v7 = vmul.f32 0.5, %v30_v5 }
  0x26   :  { %492 = verf.f32 %v32_v6 }
  0x30   :  { %v493_v8 = vpop.eup %492 }
  0x31   :  { %v34_v9 = vadd.f32 1.0, %v493_v8 }
  0x33   :  { %v35_v10 = vmul.f32 %v34_v9, %v31_v7 }
  0x35   :  { %v37_v11 = vmul.f32 0.70710677, %v35_v10  ;;  %v36_v12 = vmul.f32 0.5, %v35_v10 }
  0x37   :  { %494 = verf.f32 %v37_v11 }
  0x41   :  { %v495_v13 = vpop.eup %494 }
  0x42   :  { %v39_v14 = vadd.f32 1.0, %v495_v13 }
  0x44   :  { %v40_v15 = vmul.f32 %v39_v14, %v36_v12 }
  0x46   :  { %v42_v16 = vmul.f32 0.70710677, %v40_v15  ;;  %v41_v17 = vmul.f32 0.5, %v40_v15 }
  0x48   :  { %496 = verf.f32 %v42_v16 }
  0x52   :  { %v497_v18 = vpop.eup %496 }
  0x53   :  { %v44_v19 = vadd.f32 1.0, %v497_v18 }
  0x55   :  { %v45_v20 = vmul.f32 %v44_v19, %v41_v17 }
  0x57   :  { %v47_v21 = vmul.f32 0.70710677, %v45_v20  ;;  %v46_v22 = vmul.f32 0.5, %v45_v20 }
  0x59   :  { %498 = verf.f32 %v47_v21 }
  0x63   :  { %v499_v23 = vpop.eup %498 }
  0x64   :  { %v49_v24 = vadd.f32 1.0, %v499_v23 }
  0x66   :  { %v50_v25 = vmul.f32 %v49_v24, %v46_v22 }
  0x68   :  { %v52_v26 = vmul.f32 0.70710677, %v50_v25  ;;  %v51_v27 = vmul.f32 0.5, %v50_v25 }
  0x6a   :  { %500 = verf.f32 %v52_v26 }
  0x74   :  { %v501_v28 = vpop.eup %500 }
  0x75   :  { %v54_v29 = vadd.f32 1.0, %v501_v28 }
  0x77   :  { %v638_v30 = vmul.f32 %v54_v29, %v51_v27 }
  0x79   :  { %57 = vrot.lane.b32.xlu0 %v638_v30, %s551_s0  ;;  %63 = vrot.lane.b32.xlu1 %v638_v30, %s552_s18  ;;  %s581_s0 = smov 62   ;;  %s582_s18 = smov 64  }
  0x7d   :  { %60 = vrot.lane.b32.xlu0 %v638_v30, %s553_s19  ;;  %66 = vrot.lane.b32.xlu1 %v638_v30, %s554_s20  ;;  %s583_s19 = smov 66   ;;  %s584_s20 = smov 68  }
  0x81   :  { %69 = vrot.lane.b32.xlu0 %v638_v30, %s555_s21  ;;  %72 = vrot.lane.b32.xlu1 %v638_v30, %s556_s22  ;;  %s585_s21 = smov 70   ;;  %s586_s22 = smov 72  }
  0x85   :  { %75 = vrot.lane.b32.xlu0 %v638_v30, %s557_s23  ;;  %78 = vrot.lane.b32.xlu1 %v638_v30, %s558_s24  ;;  %s587_s23 = smov 74   ;;  %s588_s24 = smov 76  }
  0x89   :  { %81 = vrot.lane.b32.xlu0 %v638_v30, %s559_s25  ;;  %84 = vrot.lane.b32.xlu1 %v638_v30, %s560_s26  ;;  %s589_s25 = smov 78   ;;  %s590_s26 = smov 80  }
  0x8d   :  { %87 = vrot.lane.b32.xlu0 %v638_v30, %s561_s27  ;;  %90 = vrot.lane.b32.xlu1 %v638_v30, %s562_s28  ;;  %s591_s27 = smov 82   ;;  %s592_s28 = smov 84  }
  0x91   :  { %93 = vrot.lane.b32.xlu0 %v638_v30, %s563_s29  ;;  %96 = vrot.lane.b32.xlu1 %v638_v30, %s564_s30  ;;  %s593_s29 = smov 86   ;;  %s594_s30 = smov 88  }
  0x95   :  { %99 = vrot.lane.b32.xlu0 %v638_v30, %s565_s2  ;;  %102 = vrot.lane.b32.xlu1 %v638_v30, %s566_s3  ;;  %s595_s2 = smov 90   ;;  %s596_s3 = smov 92  }
  0x99   :  { %105 = vrot.lane.b32.xlu0 %v638_v30, %s567_s4  ;;  %108 = vrot.lane.b32.xlu1 %v638_v30, %s568_s5  ;;  %s597_s4 = smov 94   ;;  %s598_s5 = smov 96  }
  0x9d   :  { %111 = vrot.lane.b32.xlu0 %v638_v30, %s569_s6  ;;  %114 = vrot.lane.b32.xlu1 %v638_v30, %s570_s7  ;;  %s599_s6 = smov 98   ;;  %s600_s7 = smov 100  }
  0xa1   :  { %117 = vrot.lane.b32.xlu0 %v638_v30, %s571_s8  ;;  %120 = vrot.lane.b32.xlu1 %v638_v30, %s572_s9  ;;  %s601_s8 = smov 102   ;;  %s602_s9 = smov 104  }
  0xa5   :  { %123 = vrot.lane.b32.xlu0 %v638_v30, %s573_s10  ;;  %126 = vrot.lane.b32.xlu1 %v638_v30, %s574_s11  ;;  %s603_s10 = smov 106   ;;  %s604_s11 = smov 108  }
  0xa9   :  { %129 = vrot.lane.b32.xlu0 %v638_v30, %s575_s12  ;;  %132 = vrot.lane.b32.xlu1 %v638_v30, %s576_s13  ;;  %s605_s12 = smov 110   ;;  %s606_s13 = smov 112  }
  0xad   :  { %135 = vrot.lane.b32.xlu0 %v638_v30, %s577_s14  ;;  %138 = vrot.lane.b32.xlu1 %v638_v30, %s578_s15  ;;  %s607_s14 = smov 114   ;;  %s608_s15 = smov 116  }
  0xb1   :  { %141 = vrot.lane.b32.xlu0 %v638_v30, %s579_s16  ;;  %144 = vrot.lane.b32.xlu1 %v638_v30, %s580_s17  ;;  %s609_s16 = smov 118   ;;  %s610_s17 = smov 120  }
  0xb5   :  { %147 = vrot.lane.b32.xlu0 %v638_v30, %s581_s0  ;;  %150 = vrot.lane.b32.xlu1 %v638_v30, %s582_s18  ;;  %s611_s0 = smov 122   ;;  %s612_s18 = smov 124  }
  0xb9   :  { %153 = vrot.lane.b32.xlu0 %v638_v30, %s583_s19  ;;  %156 = vrot.lane.b32.xlu1 %v638_v30, %s584_s20  ;;  %s613_s19 = smov 126   ;;  %s615_s20 = smov [#allocation6]  }
  0xbd   :  { %159 = vrot.lane.b32.xlu0 %v638_v30, %s585_s21  ;;  %162 = vrot.lane.b32.xlu1 %v638_v30, %s586_s22  ;;  %s415_s21 = sshll.u32 %s615_s20, 4  ;;  %s416_s21 = int_to_ptr.vmem [resolvable:$true] %s415_s21 }
  0xbe   :  { %s524_s22 = scalar_lea.vmem %s416_s21, 224  ;;  %p529_p9 = scmp.lt.s32.totalorder %s416_s21, %s416_s21 }
  0xbf   :  { %p525_p8 = scmp.ne.s32.totalorder %s416_s21, %s524_s22  ;;  %p530_p10 = scmp.lt.s32.totalorder %s524_s22, %s524_s22 }
  0xc1   :  { %165 = vrot.lane.b32.xlu0 %v638_v30, %s587_s23  ;;  %168 = vrot.lane.b32.xlu1 %v638_v30, %s588_s24  ;;  %p531_p11 = por %p530_p10, %p529_p9 }
  0xc3   :  { %p532_p12 = pnand %p531_p11, %p525_p8 }
  0xc5   :  { %171 = vrot.lane.b32.xlu0 %v638_v30, %s589_s25  ;;  %174 = vrot.lane.b32.xlu1 %v638_v30, %s590_s26 }
  0xc9   :  { %177 = vrot.lane.b32.xlu0 %v638_v30, %s591_s27  ;;  %180 = vrot.lane.b32.xlu1 %v638_v30, %s592_s28 }
  0xcd   :  { %183 = vrot.lane.b32.xlu0 %v638_v30, %s593_s29  ;;  %186 = vrot.lane.b32.xlu1 %v638_v30, %s594_s30 }
  0xd1   :  { %189 = vrot.lane.b32.xlu0 %v638_v30, %s595_s2  ;;  %192 = vrot.lane.b32.xlu1 %v638_v30, %s596_s3 }
  0xd5   :  { %195 = vrot.lane.b32.xlu0 %v638_v30, %s597_s4  ;;  %198 = vrot.lane.b32.xlu1 %v638_v30, %s598_s5 }
  0xd9   :  { %201 = vrot.lane.b32.xlu0 %v638_v30, %s599_s6  ;;  %204 = vrot.lane.b32.xlu1 %v638_v30, %s600_s7 }
  0xdd   :  { %207 = vrot.lane.b32.xlu0 %v638_v30, %s601_s8  ;;  %210 = vrot.lane.b32.xlu1 %v638_v30, %s602_s9 }
  0xe1   :  { %213 = vrot.lane.b32.xlu0 %v638_v30, %s603_s10  ;;  %216 = vrot.lane.b32.xlu1 %v638_v30, %s604_s11 }
  0xe5   :  { %219 = vrot.lane.b32.xlu0 %v638_v30, %s605_s12  ;;  %222 = vrot.lane.b32.xlu1 %v638_v30, %s606_s13 }
  0xe9   :  { %225 = vrot.lane.b32.xlu0 %v638_v30, %s607_s14  ;;  %228 = vrot.lane.b32.xlu1 %v638_v30, %s608_s15 }
  0xeb   :  { %v58_v31 = vpop.permute.xlu0 %57  ;;  %v64_v32 = vpop.permute.xlu1 %63 }
  0xec   :  { %v247_v33 = vsel %vm246_vm0, %v638_v30, %v58_v31  ;;  %vm278_vm0 = vcmask 277504  }
  0xed   :  { %231 = vrot.lane.b32.xlu0 %v638_v30, %s609_s16  ;;  %234 = vrot.lane.b32.xlu1 %v638_v30, %s610_s17 }
  0xef   :  { %v61_v34 = vpop.permute.xlu0 %60  ;;  %v67_v35 = vpop.permute.xlu1 %66 }
  0xf0   :  { %v249_v36 = vsel %vm248_vm1, %v247_v33, %v61_v34  ;;  %vm280_vm1 = vcmask 293888  }
  0xf1   :  { %v251_v37 = vsel %vm250_vm2, %v249_v36, %v64_v32  ;;  %237 = vrot.lane.b32.xlu0 %v638_v30, %s611_s0  ;;  %240 = vrot.lane.b32.xlu1 %v638_v30, %s612_s18  ;;  %vm282_vm2 = vcmask 310272  }
  0xf2   :  { %v253_v38 = vsel %vm252_vm3, %v251_v37, %v67_v35  ;;  %vm284_vm3 = vcmask 326656  }
  0xf3   :  { %v70_v39 = vpop.permute.xlu0 %69  ;;  %v73_v40 = vpop.permute.xlu1 %72 }
  0xf4   :  { %v255_v41 = vsel %vm254_vm4, %v253_v38, %v70_v39  ;;  %vm286_vm4 = vcmask 343040  }
  0xf5   :  { %243 = vrot.lane.b32.xlu0 %v638_v30, %s613_s19  ;;  %v257_v42 = vsel %vm256_vm5, %v255_v41, %v73_v40  ;;  %vm288_vm5 = vcmask 359424  }
  0xf7   :  { %v76_v43 = vpop.permute.xlu0 %75  ;;  %v79_v44 = vpop.permute.xlu1 %78 }
  0xf8   :  { %v259_v45 = vsel %vm258_vm6, %v257_v42, %v76_v43  ;;  %vm290_vm6 = vcmask 375808  }
  0xf9   :  { %v261_v46 = vsel %vm260_vm7, %v259_v45, %v79_v44  ;;  %vm292_vm7 = vcmask 392192  }
  0xfb   :  { %v82_v47 = vpop.permute.xlu0 %81  ;;  %v85_v48 = vpop.permute.xlu1 %84 }
  0xfc   :  { %v263_v49 = vsel %vm262_vm8, %v261_v46, %v82_v47  ;;  %vm294_vm8 = vcmask 408576  }
  0xfd   :  { %v265_v50 = vsel %vm264_vm9, %v263_v49, %v85_v48  ;;  %vm296_vm9 = vcmask 424960  }
  0xff   :  { %v88_v51 = vpop.permute.xlu0 %87  ;;  %v91_v52 = vpop.permute.xlu1 %90 }
 0x100   :  { %v267_v53 = vsel %vm266_vm10, %v265_v50, %v88_v51  ;;  %vm298_vm10 = vcmask 441344  }
 0x101   :  { %v269_v54 = vsel %vm268_vm11, %v267_v53, %v91_v52  ;;  %vm300_vm11 = vcmask 457728  }
 0x103   :  { %v94_v55 = vpop.permute.xlu0 %93  ;;  %v97_v56 = vpop.permute.xlu1 %96 }
 0x104   :  { %v271_v57 = vsel %vm270_vm12, %v269_v54, %v94_v55  ;;  %vm302_vm12 = vcmask 474112  }
 0x105   :  { %v273_v58 = vsel %vm272_vm13, %v271_v57, %v97_v56  ;;  %vm304_vm13 = vcmask 490496  }
 0x107   :  { %v100_v59 = vpop.permute.xlu0 %99  ;;  %v103_v60 = vpop.permute.xlu1 %102 }
 0x108   :  { %v275_v61 = vsel %vm274_vm14, %v273_v58, %v100_v59  ;;  %vm306_vm14 = vcmask 506880  }
 0x109   :  { %v277_v62 = vsel %vm276_vm15, %v275_v61, %v103_v60  ;;  %vm308_vm15 = vcmask 523264  }
 0x10b   :  { %v106_v63 = vpop.permute.xlu0 %105  ;;  %v109_v0 = vpop.permute.xlu1 %108 }
 0x10c   :  { %v279_v1 = vsel %vm278_vm0, %v277_v62, %v106_v63  ;;  %vm310_vm0 = vcmask 539648  }
 0x10d   :  { %v281_v2 = vsel %vm280_vm1, %v279_v1, %v109_v0  ;;  %vm312_vm1 = vcmask 556032  }
 0x10f   :  { %v112_v3 = vpop.permute.xlu0 %111  ;;  %v115_v4 = vpop.permute.xlu1 %114 }
 0x110   :  { %v283_v5 = vsel %vm282_vm2, %v281_v2, %v112_v3  ;;  %vm314_vm2 = vcmask 572416  }
 0x111   :  { %v285_v6 = vsel %vm284_vm3, %v283_v5, %v115_v4  ;;  %vm316_vm3 = vcmask 588800  }
 0x113   :  { %v118_v7 = vpop.permute.xlu0 %117  ;;  %v121_v8 = vpop.permute.xlu1 %120 }
 0x114   :  { %v287_v9 = vsel %vm286_vm4, %v285_v6, %v118_v7  ;;  %vm318_vm4 = vcmask 605184  }
 0x115   :  { %v289_v10 = vsel %vm288_vm5, %v287_v9, %v121_v8  ;;  %vm320_vm5 = vcmask 621568  }
 0x117   :  { %v124_v11 = vpop.permute.xlu0 %123  ;;  %v127_v12 = vpop.permute.xlu1 %126 }
 0x118   :  { %v291_v13 = vsel %vm290_vm6, %v289_v10, %v124_v11  ;;  %vm322_vm6 = vcmask 637952  }
 0x119   :  { %v293_v14 = vsel %vm292_vm7, %v291_v13, %v127_v12  ;;  %vm324_vm7 = vcmask 654336  }
 0x11b   :  { %v130_v15 = vpop.permute.xlu0 %129  ;;  %v133_v16 = vpop.permute.xlu1 %132 }
 0x11c   :  { %v295_v17 = vsel %vm294_vm8, %v293_v14, %v130_v15  ;;  %vm326_vm8 = vcmask 670720  }
 0x11d   :  { %v297_v18 = vsel %vm296_vm9, %v295_v17, %v133_v16  ;;  %vm328_vm9 = vcmask 687104  }
 0x11f   :  { %v136_v19 = vpop.permute.xlu0 %135  ;;  %v139_v20 = vpop.permute.xlu1 %138 }
 0x120   :  { %v299_v21 = vsel %vm298_vm10, %v297_v18, %v136_v19  ;;  %vm330_vm10 = vcmask 703488   ;;  %v614_v18 = vmov 1983009808  }
 0x121   :  { %v301_v22 = vsel %vm300_vm11, %v299_v21, %v139_v20  ;;  %vm332_vm11 = vcmask 719872   ;;  %v376_v19 = vunpack.c.l.s4 %v614_v18  ;;  %v378_v20 = vlaneseq }
 0x123   :  { %v142_v23 = vpop.permute.xlu0 %141  ;;  %v145_v24 = vpop.permute.xlu1 %144 }
 0x124   :  { %v303_v25 = vsel %vm302_vm12, %v301_v22, %v142_v23  ;;  %vm334_vm12 = vcmask 736256  }
 0x125   :  { %v305_v26 = vsel %vm304_vm13, %v303_v25, %v145_v24  ;;  %vm336_vm13 = vcmask 752640   ;;  %v377_v25 = vunpack.c.0.s8 %v376_v19 }
 0x127   :  { %v148_v27 = vpop.permute.xlu0 %147  ;;  %v151_v28 = vpop.permute.xlu1 %150 }
 0x128   :  { %v704_v29 = vsel %vm306_vm14, %v305_v26, %v148_v27  ;;  %vm338_vm14 = vcmask 769024   ;;  %v379_v26 = vshrl.u32 %v378_v20, 7 }
 0x129   :  { %v309_v30 = vsel %vm308_vm15, %v704_v29, %v151_v28  ;;  %vm340_vm15 = vcmask 785408  }
 0x12b   :  { %v154_v31 = vpop.permute.xlu0 %153  ;;  %v157_v32 = vpop.permute.xlu1 %156 }
 0x12c   :  { %v311_v33 = vsel %vm310_vm0, %v309_v30, %v154_v31  ;;  %vm342_vm0 = vcmask 801792  }
 0x12d   :  { %v313_v34 = vsel %vm312_vm1, %v311_v33, %v157_v32  ;;  %vm344_vm1 = vcmask 818176   ;;  %v380_v32 = vsub.s32 %v377_v25, %v379_v26 }
 0x12f   :  { %v160_v35 = vpop.permute.xlu0 %159  ;;  %v163_v36 = vpop.permute.xlu1 %162 }
 0x130   :  { %v315_v37 = vsel %vm314_vm2, %v313_v34, %v160_v35  ;;  %vm346_vm2 = vcmask 834560  }
 0x131   :  { %v317_v38 = vsel %vm316_vm3, %v315_v37, %v163_v36  ;;  %vm348_vm3 = vcmask 850944   ;;  %v389_v37 = vrot.slane %v704_v29, %v380_v32 }
 0x133   :  { %v166_v39 = vpop.permute.xlu0 %165  ;;  %v169_v40 = vpop.permute.xlu1 %168 }
 0x134   :  { %v319_v41 = vsel %vm318_vm4, %v317_v38, %v166_v39  ;;  %vm350_vm4 = vcmask 867328  }
 0x135   :  { %v321_v42 = vsel %vm320_vm5, %v319_v41, %v169_v40  ;;  %vm352_vm5 = vcmask 883712  }
 0x137   :  { %v172_v43 = vpop.permute.xlu0 %171  ;;  %v175_v44 = vpop.permute.xlu1 %174 }
 0x138   :  { %v323_v45 = vsel %vm322_vm6, %v321_v42, %v172_v43  ;;  %vm354_vm6 = vcmask 900096  }
 0x139   :  { %v325_v46 = vsel %vm324_vm7, %v323_v45, %v175_v44  ;;  %vm356_vm7 = vcmask 916480  }
 0x13b   :  { %v178_v47 = vpop.permute.xlu0 %177  ;;  %v181_v48 = vpop.permute.xlu1 %180 }
 0x13c   :  { %v327_v49 = vsel %vm326_vm8, %v325_v46, %v178_v47  ;;  %vm358_vm8 = vcmask 932864  }
 0x13d   :  { %v329_v50 = vsel %vm328_vm9, %v327_v49, %v181_v48  ;;  %vm360_vm9 = vcmask 949248  }
 0x13f   :  { %v184_v51 = vpop.permute.xlu0 %183  ;;  %v187_v52 = vpop.permute.xlu1 %186 }
 0x140   :  { %v331_v53 = vsel %vm330_vm10, %v329_v50, %v184_v51  ;;  %vm362_vm10 = vcmask 965632  }
 0x141   :  { %v333_v54 = vsel %vm332_vm11, %v331_v53, %v187_v52  ;;  %vm364_vm11 = vcmask 982016  }
 0x143   :  { %v190_v55 = vpop.permute.xlu0 %189  ;;  %v193_v56 = vpop.permute.xlu1 %192 }
 0x144   :  { %v335_v57 = vsel %vm334_vm12, %v333_v54, %v190_v55  ;;  %vm366_vm12 = vcmask 998400  }
 0x145   :  { %v337_v58 = vsel %vm336_vm13, %v335_v57, %v193_v56  ;;  %vm368_vm13 = vcmask 1014784  }
 0x147   :  { %v196_v59 = vpop.permute.xlu0 %195  ;;  %v199_v60 = vpop.permute.xlu1 %198 }
 0x148   :  { %v339_v61 = vsel %vm338_vm14, %v337_v58, %v196_v59  ;;  %vm370_vm14 = vcmask 1031168  }
 0x149   :  { %v341_v62 = vsel %vm340_vm15, %v339_v61, %v199_v60  ;;  %vm394_vm15 = vcmask 1041408  }
 0x14b   :  { %v202_v63 = vpop.permute.xlu0 %201  ;;  %v205_v0 = vpop.permute.xlu1 %204 }
 0x14c   :  { %v343_v1 = vsel %vm342_vm0, %v341_v62, %v202_v63  ;;  %vm395_vm0 = vcmask 1043458  }
 0x14d   :  { %v345_v2 = vsel %vm344_vm1, %v343_v1, %v205_v0  ;;  %vm396_vm1 = vmor %vm395_vm0, %vm394_vm15 }
 0x14f   :  { %v208_v3 = vpop.permute.xlu0 %207  ;;  %v211_v4 = vpop.permute.xlu1 %210 }
 0x150   :  { %v347_v5 = vsel %vm346_vm2, %v345_v2, %v208_v3  ;;  %vm397_vm2 = vcmask 521220  }
 0x151   :  { %v349_v6 = vsel %vm348_vm3, %v347_v5, %v211_v4  ;;  %vm398_vm3 = vmor %vm397_vm2, %vm396_vm1 }
 0x153   :  { %v214_v7 = vpop.permute.xlu0 %213  ;;  %v217_v8 = vpop.permute.xlu1 %216 }
 0x154   :  { %v351_v9 = vsel %vm350_vm4, %v349_v6, %v214_v7 }
 0x155   :  { %v353_v10 = vsel %vm352_vm5, %v351_v9, %v217_v8 }
 0x157   :  { %v220_v11 = vpop.permute.xlu0 %219  ;;  %v223_v12 = vpop.permute.xlu1 %222 }
 0x158   :  { %v355_v13 = vsel %vm354_vm6, %v353_v10, %v220_v11 }
 0x159   :  { %v357_v14 = vsel %vm356_vm7, %v355_v13, %v223_v12 }
 0x15b   :  { %v226_v15 = vpop.permute.xlu0 %225  ;;  %v229_v16 = vpop.permute.xlu1 %228 }
 0x15c   :  { %v359_v17 = vsel %vm358_vm8, %v357_v14, %v226_v15 }
 0x15d   :  { %v361_v21 = vsel %vm360_vm9, %v359_v17, %v229_v16 }
 0x15f   :  { %v232_v22 = vpop.permute.xlu0 %231  ;;  %v235_v23 = vpop.permute.xlu1 %234 }
 0x160   :  { %v363_v24 = vsel %vm362_vm10, %v361_v21, %v232_v22 }
 0x161   :  { %v365_v27 = vsel %vm364_vm11, %v363_v24, %v235_v23 }
 0x163   :  { %v238_v28 = vpop.permute.xlu0 %237  ;;  %v241_v31 = vpop.permute.xlu1 %240 }
 0x164   :  { %v367_v30 = vsel %vm366_vm12, %v365_v27, %v238_v28 }
 0x165   :  { %v369_v33 = vsel %vm368_vm13, %v367_v30, %v241_v31 }
 0x167   :  { %v244_v34 = vpop.permute.xlu0 %243 }
 0x168   :  { %v371_v35 = vsel %vm370_vm14, %v369_v33, %v244_v34 }
 0x169   :  { %v374_v36 = vcombine.low %v371_v35, %v371_v35 }
 0x16b   :  { %v381_v38 = vrot.slane %v374_v36, %v380_v32 }
 0x16d   :  { %v382_v39 = vcombine.low %v381_v38, %v381_v38  ;;  %v390_v40 = vcombine.low %v381_v38, %v389_v37 }
 0x16f   :  { %399 = vst.msk [vmem:[#allocation2 + $0x8] sm:$0x3f] %vm398_vm3, %v390_v40  ;;  %402 = vst [vmem:[#allocation6] sm:$0xff] %v382_v39 }
 0x176   :  { %v401_v41 = vld [vmem:[#allocation2 + $0x8] sm:$0x3f] }
 0x177   :  { %408 = vst.msk [vmem:[#allocation6 + $0x8] sm:$0x3f] %vm398_vm3, %v401_v41 }
 0x178   :  { %535 = shalt.err (!%p532_p12)
}
 0x179   :  { %s536_s25 = scalar_lea.hbm %s721_s1, 224 }
 0x17a   :  { %p537_p13 = scmp.ne.s32.totalorder %s721_s1, %s536_s25  ;;  %p540_p0 = scmp.lt.u32.totalorder %s536_s25, %s721_s1 }
 0x17c   :  { %p542_p1 = pnand %p540_p0, %p537_p13 }
 0x17e   :  { %545 = shalt.err (!%p542_p1)
}
 0x17f   :  { %418 = dma.vmem_to_hbm [thread:$0]  %s416_s21, 224, %s721_s1, [#allocation5]  }
 0x180   :  { %548 = dma.done.wait [#allocation5], 224  }
 0x181   :  { %549 = vsyncadd [#allocation5], 4294967072 }
 0x182   :  { %422 = vsyncpa [#allocation4], 1 }
 0x183   :  { %423 = vsyncpa [#allocation5], 1 }

</bundles_post_ra>
